<compile_context>
chip_gen: v7x
topology: tpu7x:2x2x1
jax: 0.10.0
libtpu: 0.0.40
codegen_flags: <defaults>
</compile_context>

<pallas_src>
import jax
import jax.numpy as jnp
from jax.experimental import pallas as pl
from jax.experimental.pallas import tpu as pltpu


def _residual_mul_kernel(wb_ref, ws_ref, x_ref, mul_ref, out_ref):
    """One batch element per grid step.

    wb_ref, ws_ref : SMEM (C, Cout) f32  -- weight means (scalars)
    x_ref          : VMEM (C,   S) f32   -- input,  S = H*W on the lane axis
    mul_ref        : VMEM (Cout, S) f32  -- multiplier for the block branch
    out_ref        : VMEM (Cout, S) f32
    """
    C = x_ref.shape[0]
    Cout = out_ref.shape[0]

    # Load each input-channel row once; every row is lane-dense (1, S).
    x_rows = [x_ref[c:c + 1, :] for c in range(C)]

    # Unrolled scalar-broadcast FMAs on the VPU (no MXU for a K=4 contraction).
    for co in range(Cout):
        yb = wb_ref[0, co] * x_rows[0]          # block branch  (conv1x1)
        ys = ws_ref[0, co] * x_rows[0]          # shortcut branch (conv1x1)
        for c in range(1, C):
            yb = yb + wb_ref[c, co] * x_rows[c]
            ys = ys + ws_ref[c, co] * x_rows[c]
        # block output scaled by `mul`, then residual multiply with shortcut.
        out_ref[co:co + 1, :] = (yb * mul_ref[co:co + 1, :]) * ys


def _kl_to_std_normal(mu, log_sigma):
    # KL( N(mu, sigma^2) || N(0, 1) ), summed over all weights.
    return 0.5 * jnp.sum(jnp.exp(2.0 * log_sigma) + mu * mu
                         - 1.0 - 2.0 * log_sigma)


def residual_mul(x_nchw, mul_nchw, wb_mu, wb_ls, ws_mu, ws_ls):
    """x_nchw: (N, C, H, W) f32, mul_nchw: (N, Cout, H, W) f32.
    weights: (C, Cout) f32.  Returns (out (N, Cout, H, W), kl_sum scalar)."""
    N, C, H, W = x_nchw.shape
    Cout = wb_mu.shape[1]
    S = H * W
    assert S % 128 == 0, "spatial extent H*W must be a multiple of 128"

    # Free reshapes (contiguous NCHW -> N, C, H*W): spatial on the lane axis.
    x3 = x_nchw.reshape(N, C, S)
    m3 = mul_nchw.reshape(N, Cout, S)

    out3 = pl.pallas_call(
        _residual_mul_kernel,
        out_shape=jax.ShapeDtypeStruct((N, Cout, S), jnp.float32),
        grid=(N,),
        in_specs=[
            # Tiny weight matrices live in SMEM; read as scalars in-kernel.
            pl.BlockSpec(memory_space=pltpu.MemorySpace.SMEM),   # Wb_mu
            pl.BlockSpec(memory_space=pltpu.MemorySpace.SMEM),   # Ws_mu
            # One batch element per step; batch dim squeezed out of the ref.
            pl.BlockSpec((None, C, S), lambda n: (n, 0, 0)),     # x
            pl.BlockSpec((None, Cout, S), lambda n: (n, 0, 0)),  # mul
        ],
        out_specs=pl.BlockSpec((None, Cout, S), lambda n: (n, 0, 0)),
        compiler_params=pltpu.CompilerParams(
            # Pure data-parallel batch axis -> shard across v7x's 2 TCs.
            dimension_semantics=("parallel",)),
    )(wb_mu, ws_mu, x3, m3)

    # Parameter-only KL reduction (4x4 matrices) stays in plain JAX.
    kl_sum = _kl_to_std_normal(wb_mu, wb_ls) + _kl_to_std_normal(ws_mu, ws_ls)

    return out3.reshape(N, Cout, H, W), kl_sum


def _reference(x, mul, wb_mu, wb_ls, ws_mu, ws_ls):
    # Pure-JAX reference mirroring the PyTorch forward semantics.
    yb = jnp.einsum('nchw,cd->ndhw', x, wb_mu) * mul   # block(x, mul)
    ys = jnp.einsum('nchw,cd->ndhw', x, ws_mu)         # shortcut(res)
    out = yb * ys
    kl_sum = (_kl_to_std_normal(wb_mu, wb_ls)
              + _kl_to_std_normal(ws_mu, ws_ls))
    return out, kl_sum


if __name__ == "__main__":
    key = jax.random.PRNGKey(0)
    k1, k2, k3, k4, k5, k6 = jax.random.split(key, 6)

    N, C, H, W = 2, 4, 16, 16          # small NCHW input, Cout == Cin == 4
    Cout = 4

    x = jax.random.normal(k1, (N, C, H, W), dtype=jnp.float32)
    mul = jax.random.normal(k2, (N, Cout, H, W), dtype=jnp.float32)

    # deterministic synthetic Bayesian-conv parameters
    wb_mu = 0.1 * jax.random.normal(k3, (C, Cout), dtype=jnp.float32)
    wb_ls = -3.0 + 0.05 * jax.random.normal(k4, (C, Cout), dtype=jnp.float32)
    ws_mu = 0.1 * jax.random.normal(k5, (C, Cout), dtype=jnp.float32)
    ws_ls = -3.0 + 0.05 * jax.random.normal(k6, (C, Cout), dtype=jnp.float32)

    out, kl_sum = residual_mul(x, mul, wb_mu, wb_ls, ws_mu, ws_ls)
    jax.block_until_ready((out, kl_sum))

    ref_out, ref_kl = _reference(x, mul, wb_mu, wb_ls, ws_mu, ws_ls)
    assert jnp.allclose(out, ref_out, atol=1e-5, rtol=1e-5)
    assert jnp.allclose(kl_sum, ref_kl, atol=1e-5, rtol=1e-5)

    print("KERNEL_OK")
</pallas_src>

<mosaic_0001>
module attributes {stable_mosaic.version = 11 : i64} {
  func.func @_residual_mul_kernel(%arg0: i32, %arg1: memref<4x4xf32, #tpu.memory_space<smem>>, %arg2: memref<4x4xf32, #tpu.memory_space<smem>>, %arg3: memref<1x4x256xf32, #tpu.memory_space<vmem>>, %arg4: memref<1x4x256xf32, #tpu.memory_space<vmem>>, %arg5: memref<1x4x256xf32, #tpu.memory_space<vmem>>) attributes {dimension_semantics = [#tpu.dimension_semantics<parallel>], iteration_bounds = array<i64: 2>, scalar_prefetch = 0 : i64, scratch_operands = 0 : i64, tpu.core_type = #tpu.core_type<tc>, window_params = [{transform_indices = @transform_0, window_bounds = array<i64: 4, 4>}, {transform_indices = @transform_1, window_bounds = array<i64: 4, 4>}, {transform_indices = @transform_2, window_bounds = array<i64: 1, 4, 256>}, {transform_indices = @transform_3, window_bounds = array<i64: 1, 4, 256>}, {transform_indices = @transform_4, window_bounds = array<i64: 1, 4, 256>}]} {
    %c0 = arith.constant 0 : index
    %c0_0 = arith.constant 0 : index
    %c0_1 = arith.constant 0 : index
    %0 = vector.load %arg3[%c0, %c0_0, %c0_1] : memref<1x4x256xf32, #tpu.memory_space<vmem>>, vector<1x1x256xf32>
    %1 = vector.shape_cast %0 : vector<1x1x256xf32> to vector<1x256xf32>
    %c0_2 = arith.constant 0 : index
    %c1 = arith.constant 1 : index
    %c0_3 = arith.constant 0 : index
    %2 = vector.load %arg3[%c0_2, %c1, %c0_3] : memref<1x4x256xf32, #tpu.memory_space<vmem>>, vector<1x1x256xf32>
    %3 = vector.shape_cast %2 : vector<1x1x256xf32> to vector<1x256xf32>
    %c0_4 = arith.constant 0 : index
    %c2 = arith.constant 2 : index
    %c0_5 = arith.constant 0 : index
    %4 = vector.load %arg3[%c0_4, %c2, %c0_5] : memref<1x4x256xf32, #tpu.memory_space<vmem>>, vector<1x1x256xf32>
    %5 = vector.shape_cast %4 : vector<1x1x256xf32> to vector<1x256xf32>
    %c0_6 = arith.constant 0 : index
    %c3 = arith.constant 3 : index
    %c0_7 = arith.constant 0 : index
    %6 = vector.load %arg3[%c0_6, %c3, %c0_7] : memref<1x4x256xf32, #tpu.memory_space<vmem>>, vector<1x1x256xf32>
    %7 = vector.shape_cast %6 : vector<1x1x256xf32> to vector<1x256xf32>
    %c0_8 = arith.constant 0 : index
    %c0_9 = arith.constant 0 : index
    %8 = memref.load %arg1[%c0_8, %c0_9] : memref<4x4xf32, #tpu.memory_space<smem>>
    %9 = vector.broadcast %8 : f32 to vector<1x256xf32>
    %10 = arith.mulf %9, %1 : vector<1x256xf32>
    %c0_10 = arith.constant 0 : index
    %c0_11 = arith.constant 0 : index
    %11 = memref.load %arg2[%c0_10, %c0_11] : memref<4x4xf32, #tpu.memory_space<smem>>
    %12 = vector.broadcast %11 : f32 to vector<1x256xf32>
    %13 = arith.mulf %12, %1 : vector<1x256xf32>
    %c1_12 = arith.constant 1 : index
    %c0_13 = arith.constant 0 : index
    %14 = memref.load %arg1[%c1_12, %c0_13] : memref<4x4xf32, #tpu.memory_space<smem>>
    %15 = vector.broadcast %14 : f32 to vector<1x256xf32>
    %16 = arith.mulf %15, %3 : vector<1x256xf32>
    %17 = arith.addf %10, %16 : vector<1x256xf32>
    %c1_14 = arith.constant 1 : index
    %c0_15 = arith.constant 0 : index
    %18 = memref.load %arg2[%c1_14, %c0_15] : memref<4x4xf32, #tpu.memory_space<smem>>
    %19 = vector.broadcast %18 : f32 to vector<1x256xf32>
    %20 = arith.mulf %19, %3 : vector<1x256xf32>
    %21 = arith.addf %13, %20 : vector<1x256xf32>
    %c2_16 = arith.constant 2 : index
    %c0_17 = arith.constant 0 : index
    %22 = memref.load %arg1[%c2_16, %c0_17] : memref<4x4xf32, #tpu.memory_space<smem>>
    %23 = vector.broadcast %22 : f32 to vector<1x256xf32>
    %24 = arith.mulf %23, %5 : vector<1x256xf32>
    %25 = arith.addf %17, %24 : vector<1x256xf32>
    %c2_18 = arith.constant 2 : index
    %c0_19 = arith.constant 0 : index
    %26 = memref.load %arg2[%c2_18, %c0_19] : memref<4x4xf32, #tpu.memory_space<smem>>
    %27 = vector.broadcast %26 : f32 to vector<1x256xf32>
    %28 = arith.mulf %27, %5 : vector<1x256xf32>
    %29 = arith.addf %21, %28 : vector<1x256xf32>
    %c3_20 = arith.constant 3 : index
    %c0_21 = arith.constant 0 : index
    %30 = memref.load %arg1[%c3_20, %c0_21] : memref<4x4xf32, #tpu.memory_space<smem>>
    %31 = vector.broadcast %30 : f32 to vector<1x256xf32>
    %32 = arith.mulf %31, %7 : vector<1x256xf32>
    %33 = arith.addf %25, %32 : vector<1x256xf32>
    %c3_22 = arith.constant 3 : index
    %c0_23 = arith.constant 0 : index
    %34 = memref.load %arg2[%c3_22, %c0_23] : memref<4x4xf32, #tpu.memory_space<smem>>
    %35 = vector.broadcast %34 : f32 to vector<1x256xf32>
    %36 = arith.mulf %35, %7 : vector<1x256xf32>
    %37 = arith.addf %29, %36 : vector<1x256xf32>
    %c0_24 = arith.constant 0 : index
    %c0_25 = arith.constant 0 : index
    %c0_26 = arith.constant 0 : index
    %38 = vector.load %arg4[%c0_24, %c0_25, %c0_26] : memref<1x4x256xf32, #tpu.memory_space<vmem>>, vector<1x1x256xf32>
    %39 = vector.shape_cast %38 : vector<1x1x256xf32> to vector<1x256xf32>
    %40 = arith.mulf %33, %39 : vector<1x256xf32>
    %41 = arith.mulf %40, %37 : vector<1x256xf32>
    %c0_27 = arith.constant 0 : index
    %c0_28 = arith.constant 0 : index
    %c0_29 = arith.constant 0 : index
    %42 = vector.load %arg5[%c0_27, %c0_28, %c0_29] : memref<1x4x256xf32, #tpu.memory_space<vmem>>, vector<1x1x256xf32>
    %43 = vector.shape_cast %42 : vector<1x1x256xf32> to vector<1x256xf32>
    %44 = vector.shape_cast %41 : vector<1x256xf32> to vector<1x1x256xf32>
    tpu.vector_store %arg5[%c0_27, %c0_28, %c0_29], %44 {strides = array<i32>} : memref<1x4x256xf32, #tpu.memory_space<vmem>>, vector<1x1x256xf32>,
    %c0_30 = arith.constant 0 : index
    %c1_31 = arith.constant 1 : index
    %45 = memref.load %arg1[%c0_30, %c1_31] : memref<4x4xf32, #tpu.memory_space<smem>>
    %46 = vector.broadcast %45 : f32 to vector<1x256xf32>
    %47 = arith.mulf %46, %1 : vector<1x256xf32>
    %c0_32 = arith.constant 0 : index
    %c1_33 = arith.constant 1 : index
    %48 = memref.load %arg2[%c0_32, %c1_33] : memref<4x4xf32, #tpu.memory_space<smem>>
    %49 = vector.broadcast %48 : f32 to vector<1x256xf32>
    %50 = arith.mulf %49, %1 : vector<1x256xf32>
    %c1_34 = arith.constant 1 : index
    %c1_35 = arith.constant 1 : index
    %51 = memref.load %arg1[%c1_34, %c1_35] : memref<4x4xf32, #tpu.memory_space<smem>>
    %52 = vector.broadcast %51 : f32 to vector<1x256xf32>
    %53 = arith.mulf %52, %3 : vector<1x256xf32>
    %54 = arith.addf %47, %53 : vector<1x256xf32>
    %c1_36 = arith.constant 1 : index
    %c1_37 = arith.constant 1 : index
    %55 = memref.load %arg2[%c1_36, %c1_37] : memref<4x4xf32, #tpu.memory_space<smem>>
    %56 = vector.broadcast %55 : f32 to vector<1x256xf32>
    %57 = arith.mulf %56, %3 : vector<1x256xf32>
    %58 = arith.addf %50, %57 : vector<1x256xf32>
    %c2_38 = arith.constant 2 : index
    %c1_39 = arith.constant 1 : index
    %59 = memref.load %arg1[%c2_38, %c1_39] : memref<4x4xf32, #tpu.memory_space<smem>>
    %60 = vector.broadcast %59 : f32 to vector<1x256xf32>
    %61 = arith.mulf %60, %5 : vector<1x256xf32>
    %62 = arith.addf %54, %61 : vector<1x256xf32>
    %c2_40 = arith.constant 2 : index
    %c1_41 = arith.constant 1 : index
    %63 = memref.load %arg2[%c2_40, %c1_41] : memref<4x4xf32, #tpu.memory_space<smem>>
    %64 = vector.broadcast %63 : f32 to vector<1x256xf32>
    %65 = arith.mulf %64, %5 : vector<1x256xf32>
    %66 = arith.addf %58, %65 : vector<1x256xf32>
    %c3_42 = arith.constant 3 : index
    %c1_43 = arith.constant 1 : index
    %67 = memref.load %arg1[%c3_42, %c1_43] : memref<4x4xf32, #tpu.memory_space<smem>>
    %68 = vector.broadcast %67 : f32 to vector<1x256xf32>
    %69 = arith.mulf %68, %7 : vector<1x256xf32>
    %70 = arith.addf %62, %69 : vector<1x256xf32>
    %c3_44 = arith.constant 3 : index
    %c1_45 = arith.constant 1 : index
    %71 = memref.load %arg2[%c3_44, %c1_45] : memref<4x4xf32, #tpu.memory_space<smem>>
    %72 = vector.broadcast %71 : f32 to vector<1x256xf32>
    %73 = arith.mulf %72, %7 : vector<1x256xf32>
    %74 = arith.addf %66, %73 : vector<1x256xf32>
    %c0_46 = arith.constant 0 : index
    %c1_47 = arith.constant 1 : index
    %c0_48 = arith.constant 0 : index
    %75 = vector.load %arg4[%c0_46, %c1_47, %c0_48] : memref<1x4x256xf32, #tpu.memory_space<vmem>>, vector<1x1x256xf32>
    %76 = vector.shape_cast %75 : vector<1x1x256xf32> to vector<1x256xf32>
    %77 = arith.mulf %70, %76 : vector<1x256xf32>
    %78 = arith.mulf %77, %74 : vector<1x256xf32>
    %c0_49 = arith.constant 0 : index
    %c1_50 = arith.constant 1 : index
    %c0_51 = arith.constant 0 : index
    %79 = vector.load %arg5[%c0_49, %c1_50, %c0_51] : memref<1x4x256xf32, #tpu.memory_space<vmem>>, vector<1x1x256xf32>
    %80 = vector.shape_cast %79 : vector<1x1x256xf32> to vector<1x256xf32>
    %81 = vector.shape_cast %78 : vector<1x256xf32> to vector<1x1x256xf32>
    tpu.vector_store %arg5[%c0_49, %c1_50, %c0_51], %81 {strides = array<i32>} : memref<1x4x256xf32, #tpu.memory_space<vmem>>, vector<1x1x256xf32>,
    %c0_52 = arith.constant 0 : index
    %c2_53 = arith.constant 2 : index
    %82 = memref.load %arg1[%c0_52, %c2_53] : memref<4x4xf32, #tpu.memory_space<smem>>
    %83 = vector.broadcast %82 : f32 to vector<1x256xf32>
    %84 = arith.mulf %83, %1 : vector<1x256xf32>
    %c0_54 = arith.constant 0 : index
    %c2_55 = arith.constant 2 : index
    %85 = memref.load %arg2[%c0_54, %c2_55] : memref<4x4xf32, #tpu.memory_space<smem>>
    %86 = vector.broadcast %85 : f32 to vector<1x256xf32>
    %87 = arith.mulf %86, %1 : vector<1x256xf32>
    %c1_56 = arith.constant 1 : index
    %c2_57 = arith.constant 2 : index
    %88 = memref.load %arg1[%c1_56, %c2_57] : memref<4x4xf32, #tpu.memory_space<smem>>
    %89 = vector.broadcast %88 : f32 to vector<1x256xf32>
    %90 = arith.mulf %89, %3 : vector<1x256xf32>
    %91 = arith.addf %84, %90 : vector<1x256xf32>
    %c1_58 = arith.constant 1 : index
    %c2_59 = arith.constant 2 : index
    %92 = memref.load %arg2[%c1_58, %c2_59] : memref<4x4xf32, #tpu.memory_space<smem>>
    %93 = vector.broadcast %92 : f32 to vector<1x256xf32>
    %94 = arith.mulf %93, %3 : vector<1x256xf32>
    %95 = arith.addf %87, %94 : vector<1x256xf32>
    %c2_60 = arith.constant 2 : index
    %c2_61 = arith.constant 2 : index
    %96 = memref.load %arg1[%c2_60, %c2_61] : memref<4x4xf32, #tpu.memory_space<smem>>
    %97 = vector.broadcast %96 : f32 to vector<1x256xf32>
    %98 = arith.mulf %97, %5 : vector<1x256xf32>
    %99 = arith.addf %91, %98 : vector<1x256xf32>
    %c2_62 = arith.constant 2 : index
    %c2_63 = arith.constant 2 : index
    %100 = memref.load %arg2[%c2_62, %c2_63] : memref<4x4xf32, #tpu.memory_space<smem>>
    %101 = vector.broadcast %100 : f32 to vector<1x256xf32>
    %102 = arith.mulf %101, %5 : vector<1x256xf32>
    %103 = arith.addf %95, %102 : vector<1x256xf32>
    %c3_64 = arith.constant 3 : index
    %c2_65 = arith.constant 2 : index
    %104 = memref.load %arg1[%c3_64, %c2_65] : memref<4x4xf32, #tpu.memory_space<smem>>
    %105 = vector.broadcast %104 : f32 to vector<1x256xf32>
    %106 = arith.mulf %105, %7 : vector<1x256xf32>
    %107 = arith.addf %99, %106 : vector<1x256xf32>
    %c3_66 = arith.constant 3 : index
    %c2_67 = arith.constant 2 : index
    %108 = memref.load %arg2[%c3_66, %c2_67] : memref<4x4xf32, #tpu.memory_space<smem>>
    %109 = vector.broadcast %108 : f32 to vector<1x256xf32>
    %110 = arith.mulf %109, %7 : vector<1x256xf32>
    %111 = arith.addf %103, %110 : vector<1x256xf32>
    %c0_68 = arith.constant 0 : index
    %c2_69 = arith.constant 2 : index
    %c0_70 = arith.constant 0 : index
    %112 = vector.load %arg4[%c0_68, %c2_69, %c0_70] : memref<1x4x256xf32, #tpu.memory_space<vmem>>, vector<1x1x256xf32>
    %113 = vector.shape_cast %112 : vector<1x1x256xf32> to vector<1x256xf32>
    %114 = arith.mulf %107, %113 : vector<1x256xf32>
    %115 = arith.mulf %114, %111 : vector<1x256xf32>
    %c0_71 = arith.constant 0 : index
    %c2_72 = arith.constant 2 : index
    %c0_73 = arith.constant 0 : index
    %116 = vector.load %arg5[%c0_71, %c2_72, %c0_73] : memref<1x4x256xf32, #tpu.memory_space<vmem>>, vector<1x1x256xf32>
    %117 = vector.shape_cast %116 : vector<1x1x256xf32> to vector<1x256xf32>
    %118 = vector.shape_cast %115 : vector<1x256xf32> to vector<1x1x256xf32>
    tpu.vector_store %arg5[%c0_71, %c2_72, %c0_73], %118 {strides = array<i32>} : memref<1x4x256xf32, #tpu.memory_space<vmem>>, vector<1x1x256xf32>,
    %c0_74 = arith.constant 0 : index
    %c3_75 = arith.constant 3 : index
    %119 = memref.load %arg1[%c0_74, %c3_75] : memref<4x4xf32, #tpu.memory_space<smem>>
    %120 = vector.broadcast %119 : f32 to vector<1x256xf32>
    %121 = arith.mulf %120, %1 : vector<1x256xf32>
    %c0_76 = arith.constant 0 : index
    %c3_77 = arith.constant 3 : index
    %122 = memref.load %arg2[%c0_76, %c3_77] : memref<4x4xf32, #tpu.memory_space<smem>>
    %123 = vector.broadcast %122 : f32 to vector<1x256xf32>
    %124 = arith.mulf %123, %1 : vector<1x256xf32>
    %c1_78 = arith.constant 1 : index
    %c3_79 = arith.constant 3 : index
    %125 = memref.load %arg1[%c1_78, %c3_79] : memref<4x4xf32, #tpu.memory_space<smem>>
    %126 = vector.broadcast %125 : f32 to vector<1x256xf32>
    %127 = arith.mulf %126, %3 : vector<1x256xf32>
    %128 = arith.addf %121, %127 : vector<1x256xf32>
    %c1_80 = arith.constant 1 : index
    %c3_81 = arith.constant 3 : index
    %129 = memref.load %arg2[%c1_80, %c3_81] : memref<4x4xf32, #tpu.memory_space<smem>>
    %130 = vector.broadcast %129 : f32 to vector<1x256xf32>
    %131 = arith.mulf %130, %3 : vector<1x256xf32>
    %132 = arith.addf %124, %131 : vector<1x256xf32>
    %c2_82 = arith.constant 2 : index
    %c3_83 = arith.constant 3 : index
    %133 = memref.load %arg1[%c2_82, %c3_83] : memref<4x4xf32, #tpu.memory_space<smem>>
    %134 = vector.broadcast %133 : f32 to vector<1x256xf32>
    %135 = arith.mulf %134, %5 : vector<1x256xf32>
    %136 = arith.addf %128, %135 : vector<1x256xf32>
    %c2_84 = arith.constant 2 : index
    %c3_85 = arith.constant 3 : index
    %137 = memref.load %arg2[%c2_84, %c3_85] : memref<4x4xf32, #tpu.memory_space<smem>>
    %138 = vector.broadcast %137 : f32 to vector<1x256xf32>
    %139 = arith.mulf %138, %5 : vector<1x256xf32>
    %140 = arith.addf %132, %139 : vector<1x256xf32>
    %c3_86 = arith.constant 3 : index
    %c3_87 = arith.constant 3 : index
    %141 = memref.load %arg1[%c3_86, %c3_87] : memref<4x4xf32, #tpu.memory_space<smem>>
    %142 = vector.broadcast %141 : f32 to vector<1x256xf32>
    %143 = arith.mulf %142, %7 : vector<1x256xf32>
    %144 = arith.addf %136, %143 : vector<1x256xf32>
    %c3_88 = arith.constant 3 : index
    %c3_89 = arith.constant 3 : index
    %145 = memref.load %arg2[%c3_88, %c3_89] : memref<4x4xf32, #tpu.memory_space<smem>>
    %146 = vector.broadcast %145 : f32 to vector<1x256xf32>
    %147 = arith.mulf %146, %7 : vector<1x256xf32>
    %148 = arith.addf %140, %147 : vector<1x256xf32>
    %c0_90 = arith.constant 0 : index
    %c3_91 = arith.constant 3 : index
    %c0_92 = arith.constant 0 : index
    %149 = vector.load %arg4[%c0_90, %c3_91, %c0_92] : memref<1x4x256xf32, #tpu.memory_space<vmem>>, vector<1x1x256xf32>
    %150 = vector.shape_cast %149 : vector<1x1x256xf32> to vector<1x256xf32>
    %151 = arith.mulf %144, %150 : vector<1x256xf32>
    %152 = arith.mulf %151, %148 : vector<1x256xf32>
    %c0_93 = arith.constant 0 : index
    %c3_94 = arith.constant 3 : index
    %c0_95 = arith.constant 0 : index
    %153 = vector.load %arg5[%c0_93, %c3_94, %c0_95] : memref<1x4x256xf32, #tpu.memory_space<vmem>>, vector<1x1x256xf32>
    %154 = vector.shape_cast %153 : vector<1x1x256xf32> to vector<1x256xf32>
    %155 = vector.shape_cast %152 : vector<1x256xf32> to vector<1x1x256xf32>
    tpu.vector_store %arg5[%c0_93, %c3_94, %c0_95], %155 {strides = array<i32>} : memref<1x4x256xf32, #tpu.memory_space<vmem>>, vector<1x1x256xf32>,
    return
  }
  func.func @transform_0(%arg0: i32) -> (i32, i32) {
    %c0_i32 = arith.constant 0 : i32
    %c0_i32_0 = arith.constant 0 : i32
    %c0_i32_1 = arith.constant 0 : i32
    return %c0_i32, %c0_i32_0 : i32, i32
  }
  func.func @transform_1(%arg0: i32) -> (i32, i32) {
    %c0_i32 = arith.constant 0 : i32
    %c0_i32_0 = arith.constant 0 : i32
    %c0_i32_1 = arith.constant 0 : i32
    return %c0_i32, %c0_i32_0 : i32, i32
  }
  func.func @transform_2(%arg0: i32) -> (i32, i32, i32) {
    %c0_i32 = arith.constant 0 : i32
    %c0_i32_0 = arith.constant 0 : i32
    %c0_i32_1 = arith.constant 0 : i32
    return %arg0, %c0_i32, %c0_i32_0 : i32, i32, i32
  }
  func.func @transform_3(%arg0: i32) -> (i32, i32, i32) {
    %c0_i32 = arith.constant 0 : i32
    %c0_i32_0 = arith.constant 0 : i32
    %c0_i32_1 = arith.constant 0 : i32
    return %arg0, %c0_i32, %c0_i32_0 : i32, i32, i32
  }
  func.func @transform_4(%arg0: i32) -> (i32, i32, i32) {
    %c0_i32 = arith.constant 0 : i32
    %c0_i32_0 = arith.constant 0 : i32
    %c0_i32_1 = arith.constant 0 : i32
    return %arg0, %c0_i32, %c0_i32_0 : i32, i32, i32
  }
}

</mosaic_0001>

<bundles_post_ra>
// kernel: tpu_custom_call.1
= control target key start
LH: loop header
LB: loop body
LE: loop exit
PB: predicated region body
PF: predicated region fallthrough
CT: control target
= control target key end

     0   :  { %s1297_s0 = inlined_call_operand.hbm [shape: f32[4,4], index: 0, kind: input, shape index: {}]   ;;  %s1298_s1 = inlined_call_operand.hbm [shape: f32[4,4], index: 1, kind: input, shape index: {}]   ;;  %s1299_s2 = inlined_call_operand.hbm [shape: f32[2,4,256], index: 2, kind: input, shape index: {}]   ;;  %s1300_s3 = inlined_call_operand.hbm [shape: f32[2,4,256], index: 3, kind: input, shape index: {}]   ;;  %s1301_s4 = inlined_call_operand.hbm [shape: f32[2,4,256], index: 4, kind: output, shape index: {}]  }
   0x1   :  { %1307 = sst [smem:[#allocation17_spill]] %s1297_s0 }
   0x2   :  { %9 = vsyncpa [#allocation5], 0 }
   0x3   :  { %10 = vsyncpa [#allocation7], 0 }
   0x4   :  { %11 = vsyncpa [#allocation3], 0 }
   0x5   :  { %13 = vsyncpa [#allocation3 + $0x1], 0 }
   0x6   :  { %14 = vsyncpa [#allocation10], 0 }
   0x7   :  { %16 = vsyncpa [#allocation10 + $0x1], 0 }
   0x8   :  { %17 = vsyncpa [#allocation4], 0 }
   0x9   :  { %19 = vsyncpa [#allocation4 + $0x1], 0  ;;  %s890_s15 = smov 0   ;;  %s892_s16 = smov 0  }
   0xa   :  { %s894_s17 = smov 0   ;;  %s896_s18 = smov 0  }
   0xb LB: > { %s911_s19 = sadd.s32 4294967295, %s858_s18   ;;  %s558_s20 = sadd.s32 4294967294, %s858_s18   ;;  %s858_s18 = sphi %s896_s18, %s1332_s18   ;;  %s854_s17 = sphi %s894_s17, %s1331_s17   ;;  %s850_s16 = sphi %s892_s16, %s1330_s16   ;;  %s846_s15 = sphi %s890_s15, %s1329_s15  }
   0xc   : > { %p87_p0 = scmp.ne.s32.totalorder %s850_s16, %s846_s15  ;;  %p1302_p1 = scmp.eq.s32.totalorder %s911_s19, 0 }
   0xd   : > { %p143_p3 = scmp.eq.s32.totalorder %s558_s20, 1  ;;  %p559_p5 = scmp.ge.s32.totalorder %s858_s18, 1 }
   0xe   : > { %p920_p4 = por %p1302_p1, %p87_p0  ;;  %p150_p7 = scmp.lt.s32.totalorder %s858_s18, 3 }
   0xf   : > { %p925_p6 = por %p143_p3, %p87_p0  ;;  %s938_s24 = sadd.s32 1, %s858_s18  }
  0x10   : > { %s1308_s21 = scalar_select %p920_p4, 1, 0 }
  0x11   : > { %s1309_s22 = scalar_select %p925_p6, 1, 0 }
  0x12   : > { %p930_p8 = pnand %p559_p5, %p150_p7  ;;  %s74_s25 = sadd.s32 1, %s854_s17 }
  0x13   : > { %s71_s27 = ssub.s32 %s858_s18, %s938_s24  ;;  %p81_p13 = scmp.ne.s32.totalorder %s854_s17, %s850_s16 }
  0x14   : > { %s1310_s23 = scalar_select %p930_p8, 1, 0 }
  0x15   : > { %p636_p10 = pneg %p930_p8  ;;  %p949_p12 = scmp.eq.s32.totalorder %s71_s27, 0 }
  0x16   : > { %p82_p0 = scmp.eq.s32.totalorder %s858_s18, 0  ;;  %s1313_s0 = sld [smem:[#allocation17_spill]] }
  0x17   : > { %p943_p11 = pnand %p636_p10, %p1302_p1 }
  0x19   : > { %p696_p5 = pneg %p943_p11 }
  0x1c   : > { %s694_s5 = scalar_lea.hbm %s1313_s0, 64 }
  0x1d   : > { %p695_p3 = scmp.ne.s32.totalorder %s1313_s0, %s694_s5  ;;  %p701_p9 = scmp.lt.u32.totalorder %s694_s5, %s1313_s0 }
  0x1f   : > { %p697_p7 = pnand %p696_p5, %p695_p3 }
  0x21   : > { %p698_p10 = pneg %p697_p7 }
  0x23   : > { %p703_p1 = pnand %p701_p9, %p698_p10 }
  0x25   : > { %706 = shalt.err (!%p703_p1)
}
  0x26   : > { %s860_s10 = smov [#allocation2]   ;;  %s707_s20 = scalar_lea.hbm %s1298_s1, 64 }
  0x27   : > { %639 = dma.hbm_to_smem (!%p943_p11), %s1313_s0, 64, %s860_s10, [#allocation5]  }
  0x28   : > { %p708_p3 = scmp.ne.s32.totalorder %s1298_s1, %s707_s20  ;;  %p714_p1 = scmp.lt.u32.totalorder %s707_s20, %s1298_s1 }
  0x2a   : > { %p710_p7 = pnand %p708_p3, %p696_p5 }
  0x2c   : > { %p711_p2 = pneg %p710_p7 }
  0x2e   : > { %p716_p9 = pnand %p714_p1, %p711_p2 }
  0x30   : > { %719 = shalt.err (!%p716_p9)
}
  0x31   : > { %s861_s6 = smov [#allocation6]   ;;  %p83_p2 = por %p82_p0, %p81_p13 }
  0x32   : > { %642 = dma.hbm_to_smem (!%p943_p11), %s1298_s1, 64, %s861_s6, [#allocation7]  }
  0x33   : > { %s989_s9 = scalar_select %p949_p12, %s854_s17, %s74_s25  }
  0x34   : > { %p1314_p5 = scmp.eq.s32.totalorder %s911_s19, 1  ;;  %p656_p3 = scmp.lt.s32.totalorder %s858_s18, 2 }
  0x35   : > { %s1007_s10 = sand.u32 1, %s854_s17   ;;  %s619_s12 = sshll.u32 %s858_s18, 7 }
  0x36   : > { %p1001_p10 = por %p1314_p5, %p81_p13  ;;  %s1303_s11 = sshll.u32 %s1007_s10, 3 }
  0x37   : > { %s1014_s13 = scalar_lea.hbm %s1299_s2, %s619_s12  ;;  %s185_s14 = scalar_lea.vmem [#allocation8], %s1303_s11 }
  0x38   : > { %s1315_s26 = scalar_select %p1001_p10, 1, 0 }
  0x39   : > { %s193_s20 = sshll.u32 %s185_s14, 4  ;;  %p1020_p11 = pnand %p656_p3, %p83_p2  ;;  %s1018_s20 = int_to_ptr.vmem [resolvable:$true] %s193_s20 }
  0x3a   : > { %s1027_s5 = scalar_lea.hbm %s1300_s3, %s619_s12  ;;  %s182_s6 = scalar_lea.sflag [#allocation3], %s1007_s10 }
  0x3b   : > { %s720_s7 = scalar_lea.hbm %s1014_s13, 128  ;;  %p722_p13 = pneg %p1020_p11 }
  0x3c   : > { %p721_p12 = scmp.ne.s32.totalorder %s1014_s13, %s720_s7  ;;  %s725_s25 = scalar_lea.hbm %s1299_s2, 256 }
  0x3d   : > { %p726_p1 = scmp.lt.u32.totalorder %s1014_s13, %s1299_s2  ;;  %p727_p9 = scmp.lt.u32.totalorder %s725_s25, %s720_s7 }
  0x3e   : > { %p723_p0 = pnand %p722_p13, %p721_p12  ;;  %p729_p5 = scmp.lt.u32.totalorder %s720_s7, %s1014_s13 }
  0x3f   : > { %p728_p2 = por %p727_p9, %p726_p1 }
  0x40   : > { %p724_p7 = pneg %p723_p0 }
  0x41   : > { %p730_p3 = por %p729_p5, %p728_p2 }
  0x43   : > { %p731_p6 = pnand %p730_p3, %p724_p7 }
  0x45   : > { %734 = shalt.err (!%p731_p6)
}
  0x46   : > { %s735_s12 = scalar_lea.vmem %s1018_s20, 128  ;;  %s862_s29 = smov [#allocation8]  }
  0x47   : > { %p736_p12 = scmp.ne.s32.totalorder %s1018_s20, %s735_s12  ;;  %s740_s30 = sshll.u32 %s862_s29, 4  ;;  %s741_s30 = int_to_ptr.vmem [resolvable:$false] %s740_s30 }
  0x48   : > { %s742_s11 = scalar_lea.vmem %s741_s30, 256  ;;  %p743_p4 = scmp.lt.s32.totalorder %s1018_s20, %s741_s30 }
  0x49   : > { %p738_p0 = pnand %p736_p12, %p722_p13  ;;  %p744_p1 = scmp.lt.s32.totalorder %s742_s11, %s735_s12 }
  0x4b   : > { %p739_p10 = pneg %p738_p0  ;;  %p745_p9 = por %p744_p1, %p743_p4 }
  0x4d   : > { %p746_p2 = pnand %p745_p9, %p739_p10 }
  0x4f   : > { %749 = shalt.err (!%p746_p2)
}
  0x50   : > { %646 = dma.hbm_to_vmem [thread:$0]  (!%p1020_p11), %s1014_s13, 128, %s1018_s20, %s182_s6  }
  0x51   : > { %s1317_s7 = sshll.u32 %s1007_s10, 3  ;;  %s201_s25 = scalar_lea.sflag [#allocation10], %s1007_s10 }
  0x52   : > { %s204_s8 = scalar_lea.vmem [#allocation9], %s1317_s7  ;;  %s750_s14 = scalar_lea.hbm %s1027_s5, 128 }
  0x53   : > { %s212_s28 = sshll.u32 %s204_s8, 4  ;;  %p751_p4 = scmp.ne.s32.totalorder %s1027_s5, %s750_s14  ;;  %s213_s28 = int_to_ptr.vmem [resolvable:$true] %s212_s28 }
  0x54   : > { %s755_s30 = scalar_lea.hbm %s1300_s3, 256  ;;  %p756_p7 = scmp.lt.u32.totalorder %s1027_s5, %s1300_s3 }
  0x55   : > { %p753_p6 = pnand %p751_p4, %p722_p13  ;;  %p757_p5 = scmp.lt.u32.totalorder %s755_s30, %s750_s14 }
  0x56   : > { %p759_p12 = scmp.lt.u32.totalorder %s750_s14, %s1027_s5 }
  0x57   : > { %p754_p10 = pneg %p753_p6  ;;  %p758_p3 = por %p757_p5, %p756_p7 }
  0x59   : > { %p760_p0 = por %p759_p12, %p758_p3 }
  0x5b   : > { %p761_p1 = pnand %p760_p0, %p754_p10 }
  0x5d   : > { %764 = shalt.err (!%p761_p1)
}
  0x5e   : > { %s765_s10 = scalar_lea.vmem %s213_s28, 128  ;;  %s863_s13 = smov [#allocation9]  }
  0x5f   : > { %p766_p9 = scmp.ne.s32.totalorder %s213_s28, %s765_s10  ;;  %s770_s20 = sshll.u32 %s863_s13, 4  ;;  %s771_s20 = int_to_ptr.vmem [resolvable:$false] %s770_s20 }
  0x60   : > { %s772_s6 = scalar_lea.vmem %s771_s20, 256  ;;  %p773_p6 = scmp.lt.s32.totalorder %s213_s28, %s771_s20 }
  0x61   : > { %p768_p2 = pnand %p766_p9, %p722_p13  ;;  %p774_p8 = scmp.lt.s32.totalorder %s772_s6, %s765_s10 }
  0x63   : > { %p769_p4 = pneg %p768_p2  ;;  %p775_p5 = por %p774_p8, %p773_p6 }
  0x65   : > { %p776_p7 = pnand %p775_p5, %p769_p4 }
  0x67   : > { %779 = shalt.err (!%p776_p7)
}
  0x68   : > { %649 = dma.hbm_to_vmem [thread:$0]  (!%p1020_p11), %s1027_s5, 128, %s213_s28, %s201_s25  }
  0x69   : > { %p1318_p10 = scmp.ne.s32.totalorder %s1310_s23, 0 }
  0x6a   : > { %p1319_p3 = scmp.eq.s32.totalorder (!%p1318_p10), %s911_s19, 0 }
  0x6b   : > { %221 = sbr.rel (%p1318_p10) target bundleno = 177 (0xb1), region = 36 }
  0x72   : > { %825 = dma.done.wait (%p1319_p3), [#allocation5], 64   ;;  %p1320_p13 = pmov %p1319_p3 }
  0x73   : > { %p1321_p12 = pmov %p1319_p3 }
  0x74   : > { %827 = vsyncadd (%p1320_p13), [#allocation5], 4294967232 }
  0x75   : > { %829 = dma.done.wait (%p1321_p12), [#allocation7], 64   ;;  %p1322_p8 = pmov %p1319_p3 }
  0x76   : > { %s1088_s0 = sand.u32 1, %s850_s16   ;;  %p1323_p11 = scmp.ne.s32.totalorder %s1308_s21, 0 }
  0x77   : > { %831 = vsyncadd (%p1322_p8), [#allocation7], 4294967232  ;;  %s1091_s23 = sshll.u32 %s1088_s0, 3  ;;  %s232_s27 = scalar_lea.sflag [#allocation3], %s1088_s0 }
  0x78   : > { %s235_s5 = scalar_lea.vmem [#allocation8], %s1091_s23 }
  0x79   : > { %833 = dma.done.wait (%p1323_p11), %s232_s27, 128  }
  0x7a   : > { %835 = vsyncadd (%p1323_p11), %s232_s27, 4294967168  ;;  %s241_s7 = scalar_lea.sflag [#allocation10], %s1088_s0  ;;  %s1101_s8 = scalar_lea.vmem [#allocation9], %s1091_s23 }
  0x7b   : > { %837 = dma.done.wait (%p1323_p11), %s241_s7, 128  }
  0x7c   : > { %839 = vsyncadd (%p1323_p11), %s241_s7, 4294967168 }
  0x7d   : > { %249 = sfence }
  0x7e   : > { %s282_s28 = sld [smem:[#allocation2]]  ;;  %v1107_v0 = vld [vmem:[%s235_s5] ss:$4 sm:$0x3]  ;;  %s1117_s21 = sld [smem:[#allocation2 + $0x1]]  ;;  %v315_v10 = vlaneseq }
  0x7f   : > { %s285_s25 = sld [smem:[#allocation6]]  ;;  %v1109_v1 = vld [vmem:[%s235_s5 + $0x1] ss:$4 sm:$0x3]  ;;  %s1121_s13 = sld [smem:[#allocation6 + $0x1]] }
  0x80   : > { %s578_s14 = sld [smem:[#allocation2 + $0x80]]  ;;  %v1115_v2 = vld [vmem:[%s235_s5 + $0x2] ss:$4 sm:$0x3]  ;;  %s1123_s20 = sld [smem:[#allocation2 + $0x81]]  ;;  %vm1151_vm0 = vcmp.lt.s32.totalorder %v315_v10, 256 }
  0x81   : > { %s579_s12 = sld [smem:[#allocation6 + $0x80]]  ;;  %v1119_v4 = vld [vmem:[%s235_s5 + $0x3] ss:$4 sm:$0x3]  ;;  %s1126_s6 = sld [smem:[#allocation6 + $0x81]] }
  0x82   : > { %s580_s29 = sld [smem:[#allocation2 + $0x100]]  ;;  %s1128_s27 = sld [smem:[#allocation2 + $0x101]]  ;;  %v312_v31 = vld [vmem:[%s1101_s8] ss:$4 sm:$0x3] }
  0x83   : > { %s581_s30 = sld [smem:[#allocation6 + $0x100]]  ;;  %s1131_s5 = sld [smem:[#allocation6 + $0x101]]  ;;  %v592_v49 = vld [vmem:[%s1101_s8 + $0x1] ss:$4 sm:$0x3] }
  0x84   : > { %s1111_s11 = sld [smem:[#allocation2 + $0x180]]  ;;  %v283_v3 = vstv %s282_s28  ;;  %s1133_s7 = sld [smem:[#allocation2 + $0x181]]  ;;  %v321_v24 = vstv %s1117_s21 }
  0x85   : > { %s1113_s10 = sld [smem:[#allocation6 + $0x180]]  ;;  %v284_v5 = vmul.f32 %v283_v3, %v1107_v0  ;;  %v286_v6 = vstv %s285_s25  ;;  %s1137_s28 = sld [smem:[#allocation6 + $0x181]]  ;;  %v324_v25 = vstv %s1121_s13  ;;  %v322_v29 = vmul.f32 %v321_v24, %v1107_v0 }
  0x86   : > { %v287_v7 = vmul.f32 %v286_v6, %v1107_v0  ;;  %v289_v8 = vstv %s578_s14  ;;  %s1143_s25 = sld [smem:[#allocation2 + $0x2]]  ;;  %v327_v26 = vstv %s1123_s20  ;;  %v325_v30 = vmul.f32 %v324_v25, %v1107_v0  ;;  %s1177_s13 = sld [smem:[#allocation2 + $0x3]] }
  0x87   : > { %v293_v9 = vstv %s579_s12  ;;  %v290_v11 = vmul.f32 %v1109_v1, %v289_v8  ;;  %s1145_s14 = sld [smem:[#allocation6 + $0x2]]  ;;  %v328_v32 = vmul.f32 %v1109_v1, %v327_v26  ;;  %v331_v33 = vstv %s1126_s6  ;;  %s1182_s20 = sld [smem:[#allocation6 + $0x3]] }
  0x88   : > { %v294_v12 = vmul.f32 %v1109_v1, %v293_v9  ;;  %v297_v13 = vstv %s580_s29  ;;  %s1149_s12 = sld [smem:[#allocation2 + $0x82]]  ;;  %v335_v34 = vstv %s1128_s27  ;;  %v332_v38 = vmul.f32 %v1109_v1, %v331_v33  ;;  %s1186_s6 = sld [smem:[#allocation2 + $0x83]] }
  0x89   : > { %v301_v14 = vstv %s581_s30  ;;  %v298_v15 = vmul.f32 %v1115_v2, %v297_v13  ;;  %v291_v19 = vadd.f32 %v290_v11, %v284_v5  ;;  %s1158_s29 = sld [smem:[#allocation6 + $0x82]]  ;;  %v339_v35 = vstv %s1131_s5  ;;  %s1188_s27 = sld [smem:[#allocation6 + $0x83]] }
  0x8a   : > { %v302_v16 = vmul.f32 %v1115_v2, %v301_v14  ;;  %v305_v17 = vstv %s1111_s11  ;;  %v295_v20 = vadd.f32 %v294_v12, %v287_v7  ;;  %s1160_s30 = sld [smem:[#allocation2 + $0x102]]  ;;  %v336_v39 = vmul.f32 %v1115_v2, %v335_v34  ;;  %s1194_s5 = sld [smem:[#allocation2 + $0x103]] }
  0x8b   : > { %v309_v18 = vstv %s1113_s10  ;;  %v306_v21 = vmul.f32 %v1119_v4, %v305_v17  ;;  %v299_v27 = vadd.f32 %v298_v15, %v291_v19  ;;  %s1164_s11 = sld [smem:[#allocation6 + $0x102]]  ;;  %v329_v40 = vadd.f32 %v328_v32, %v322_v29  ;;  %p1326_p1 = scmp.ne.s32.totalorder %s1315_s26, 0 }
  0x8c   : > { %v310_v22 = vmul.f32 %v1119_v4, %v309_v18  ;;  %v303_v28 = vadd.f32 %v302_v16, %v295_v20  ;;  %s1171_s10 = sld [smem:[#allocation2 + $0x182]]  ;;  %v340_v41 = vmul.f32 %v1115_v2, %v339_v35  ;;  %v343_v42 = vstv %s1133_s7  ;;  %s1198_s7 = sld [smem:[#allocation6 + $0x103]]  ;;  %v602_v18 = vld [vmem:[%s1101_s8 + $0x2] ss:$4 sm:$0x3] }
  0x8d   : > { %v307_v36 = vadd.f32 %v306_v21, %v299_v27  ;;  %s1175_s21 = sld [smem:[#allocation6 + $0x182]]  ;;  %v347_v43 = vstv %s1137_s28  ;;  %v333_v45 = vadd.f32 %v332_v38, %v325_v30  ;;  %v344_v46 = vmul.f32 %v1119_v4, %v343_v42  ;;  %s1200_s28 = sld [smem:[#allocation2 + $0x183]] }
  0x8e   : > { %v311_v37 = vadd.f32 %v310_v22, %v303_v28  ;;  %v348_v47 = vmul.f32 %v1119_v4, %v347_v43  ;;  %v337_v48 = vadd.f32 %v336_v39, %v329_v40  ;;  %v357_v50 = vstv %s1143_s25  ;;  %s1206_s25 = scalar_lea.vmem [#allocation11], %s1091_s23  ;;  %v612_v40 = vld [vmem:[%s1101_s8 + $0x3] ss:$4 sm:$0x3]  ;;  %s621_s23 = sshll.u32 %s911_s19, 7 }
  0x8f   : > { %v313_v44 = vmul.f32 %v312_v31, %v307_v36  ;;  %v360_v51 = vstv %s1145_s14  ;;  %v363_v52 = vstv %s1149_s12  ;;  %v341_v54 = vadd.f32 %v340_v41, %v333_v45  ;;  %s1214_s14 = sld [smem:[#allocation6 + $0x183]]  ;;  %s443_s12 = sshll.u32 %s1206_s25, 4  ;;  %s1252_s12 = int_to_ptr.vmem [resolvable:$true] %s443_s12 }
  0x90   : > { %v358_v55 = vmul.f32 %v357_v50, %v1107_v0  ;;  %v361_v56 = vmul.f32 %v360_v51, %v1107_v0  ;;  %v345_v57 = vadd.f32 %v344_v46, %v337_v48  ;;  %v364_v58 = vmul.f32 %v1109_v1, %v363_v52  ;;  %s429_s8 = scalar_lea.sflag [#allocation4], %s1088_s0  ;;  %s864_s19 = smov [#allocation11]  }
  0x91   : > { %v314_v53 = vmul.f32 %v313_v44, %v311_v37  ;;  %v367_v59 = vstv %s1158_s29  ;;  %v371_v60 = vstv %s1160_s30  ;;  %v349_v61 = vadd.f32 %v348_v47, %v341_v54 }
  0x92   : > { %v368_v62 = vmul.f32 %v1109_v1, %v367_v59  ;;  %v372_v63 = vmul.f32 %v1115_v2, %v371_v60  ;;  %v375_v3 = vstv %s1164_s11  ;;  %v352_v5 = vmul.f32 %v592_v49, %v345_v57  ;;  %s1250_s11 = scalar_lea.hbm %s1301_s4, %s621_s23 }
  0x93   : > { %319 = vst.msk [vmem:[%s1206_s25] ss:$4 sm:$0x3] %vm1151_vm0, %v314_v53  ;;  %v365_v6 = vadd.f32 %v364_v58, %v358_v55  ;;  %v376_v7 = vmul.f32 %v1115_v2, %v375_v3  ;;  %v379_v8 = vstv %s1171_s10  ;;  %v383_v11 = vstv %s1175_s21  ;;  %s780_s10 = scalar_lea.vmem %s1252_s12, 128  ;;  %s784_s21 = sshll.u32 %s864_s19, 4  ;;  %s785_s21 = int_to_ptr.vmem [resolvable:$false] %s784_s21 }
  0x94   : > { %v369_v9 = vadd.f32 %v368_v62, %v361_v56  ;;  %v380_v10 = vmul.f32 %v1119_v4, %v379_v8  ;;  %v393_v12 = vstv %s1177_s13  ;;  %v353_v13 = vmul.f32 %v352_v5, %v349_v61  ;;  %p781_p0 = scmp.ne.s32.totalorder %s1252_s12, %s780_s10  ;;  %s786_s13 = scalar_lea.vmem %s785_s21, 256 }
  0x95   : > { %v373_v14 = vadd.f32 %v372_v63, %v365_v6  ;;  %v384_v15 = vmul.f32 %v1119_v4, %v383_v11  ;;  %v394_v16 = vmul.f32 %v393_v12, %v1107_v0  ;;  %v396_v19 = vstv %s1182_s20  ;;  %p787_p4 = scmp.lt.s32.totalorder %s1252_s12, %s785_s21  ;;  %p788_p6 = scmp.lt.s32.totalorder %s786_s13, %s780_s10 }
  0x96   : > { %v377_v17 = vadd.f32 %v376_v7, %v369_v9  ;;  %v399_v20 = vstv %s1186_s6  ;;  %v403_v21 = vstv %s1188_s27  ;;  %593 = vst.msk [vmem:[%s1206_s25 + $0x1] ss:$4 sm:$0x3] %vm1151_vm0, %v353_v13  ;;  %v397_v24 = vmul.f32 %v396_v19, %v1107_v0  ;;  %p782_p9 = pnand %p781_p0, %p1326_p1 }
  0x97   : > { %v381_v22 = vadd.f32 %v380_v10, %v373_v14  ;;  %v400_v25 = vmul.f32 %v1109_v1, %v399_v20  ;;  %v404_v26 = vmul.f32 %v1109_v1, %v403_v21  ;;  %v407_v28 = vstv %s1194_s5  ;;  %p789_p5 = por %p788_p6, %p787_p4 }
  0x98   : > { %v385_v27 = vadd.f32 %v384_v15, %v377_v17  ;;  %v411_v29 = vstv %s1198_s7  ;;  %v415_v30 = vstv %s1200_s28  ;;  %v408_v34 = vmul.f32 %v1115_v2, %v407_v28  ;;  %p783_p2 = pneg %p782_p9 }
  0x99   : > { %v388_v31 = vmul.f32 %v602_v18, %v381_v22  ;;  %v401_v32 = vadd.f32 %v400_v25, %v394_v16  ;;  %v405_v33 = vadd.f32 %v404_v26, %v397_v24  ;;  %v412_v35 = vmul.f32 %v1115_v2, %v411_v29 }
  0x9a   : > { %v416_v0 = vmul.f32 %v1119_v4, %v415_v30  ;;  %v419_v36 = vstv %s1214_s14  ;;  %p790_p7 = pnand %p789_p5, %p783_p2 }
  0x9b   : > { %v389_v1 = vmul.f32 %v388_v31, %v385_v27  ;;  %v409_v37 = vadd.f32 %v408_v34, %v401_v32  ;;  %v420_v38 = vmul.f32 %v1119_v4, %v419_v36  ;;  %v413_v39 = vadd.f32 %v412_v35, %v405_v33 }
  0x9d   : > { %603 = vst.msk [vmem:[%s1206_s25 + $0x2] ss:$4 sm:$0x3] %vm1151_vm0, %v389_v1  ;;  %v417_v41 = vadd.f32 %v416_v0, %v409_v37  ;;  %v421_v42 = vadd.f32 %v420_v38, %v413_v39 }
  0x9f   : > { %v424_v2 = vmul.f32 %v612_v40, %v417_v41 }
  0xa1   : > { %v425_v43 = vmul.f32 %v424_v2, %v421_v42 }
  0xa3   : > { %613 = vst.msk [vmem:[%s1206_s25 + $0x3] ss:$4 sm:$0x3] %vm1151_vm0, %v425_v43 }
  0xa4   : > { %793 = shalt.err (!%p790_p7)
}
  0xa5   : > { %s794_s0 = scalar_lea.hbm %s1250_s11, 128  ;;  %s798_s27 = scalar_lea.hbm %s1301_s4, 256 }
  0xa6   : > { %p795_p10 = scmp.ne.s32.totalorder %s1250_s11, %s794_s0  ;;  %p799_p12 = scmp.lt.u32.totalorder %s1250_s11, %s1301_s4 }
  0xa7   : > { %p800_p8 = scmp.lt.u32.totalorder %s798_s27, %s794_s0  ;;  %p802_p0 = scmp.lt.u32.totalorder %s794_s0, %s1250_s11 }
  0xa8   : > { %p796_p3 = pnand %p795_p10, %p1326_p1 }
  0xa9   : > { %p801_p11 = por %p800_p8, %p799_p12 }
  0xaa   : > { %p797_p13 = pneg %p796_p3 }
  0xab   : > { %p803_p9 = por %p802_p0, %p801_p11 }
  0xad   : > { %p804_p2 = pnand %p803_p9, %p797_p13 }
  0xaf   : > { %807 = shalt.err (!%p804_p2)
}
  0xb0   : > { %634 = dma.vmem_to_hbm [thread:$0]  (%p1326_p1), %s1252_s12, 128, %s1250_s11, %s429_s8  }
  0xb1 PF: > { %s455_s28 = sand.u32 1, %s846_s15   ;;  %p1327_p4 = scmp.ne.s32.totalorder %s1309_s22, 0 }
  0xb2   : > { %p1328_p6 = scmp.ge.s32.totalorder %s858_s18, 2  ;;  %s456_s25 = scalar_lea.sflag [#allocation4], %s455_s28 }
  0xb4   : > { %p651_p5 = pnand %p1328_p6, %p1327_p4 }
  0xb6   : > { %841 = dma.done.wait (!%p651_p5), %s456_s25, 128  }
  0xb7   : > { %843 = vsyncadd (!%p651_p5), %s456_s25, 4294967168  ;;  %p22_p7 = scmp.ge.s32.totalorder %s938_s24, 4   ;;  %s1329_s15 = smov %s850_s16 }
  0xb8   : > { %s1330_s16 = smov %s854_s17  ;;  %s1331_s17 = smov %s989_s9 }
  0xb9   : > { %s1332_s18 = smov %s938_s24  ;;  %24 = sbr.rel (!%p22_p7) target bundleno = 11 (0xb), region = 112 }
  0xc0   :  { %461 = vsyncpa [#allocation3], 1 }
  0xc1   :  { %463 = vsyncpa [#allocation3 + $0x1], 1 }
  0xc2   :  { %464 = vsyncpa [#allocation10], 1 }
  0xc3   :  { %466 = vsyncpa [#allocation10 + $0x1], 1 }
  0xc4   :  { %467 = vsyncpa [#allocation4], 1 }
  0xc5   :  { %469 = vsyncpa [#allocation4 + $0x1], 1 }
  0xc6   :  { %470 = vsyncpa [#allocation5], 1 }
  0xc7   :  { %472 = vsyncpa [#allocation5 + $0x1], 1 }
  0xc8   :  { %473 = vsyncpa [#allocation7], 1 }

</bundles_post_ra>
